<compile_context>
chip_gen: v5e
topology: v5e:2x2
jax: 0.10.0
libtpu: 0.0.40
codegen_flags: <defaults>
</compile_context>

<pallas_src>
import jax
import jax.numpy as jnp
from jax.experimental import pallas as pl
from jax.experimental.pallas import tpu as pltpu

_LANE = 128
# Preferred lane widths (wide first) -> pick one that divides the element
# count exactly so no pad/slice HBM round-trip is needed.
_LANE_CHOICES = (2048, 1024, 512, 256, 128)
# ~2 MiB of f32 per block (in + out, double-buffered => ~8 MiB VMEM).
_TARGET_BLOCK_ELEMS = 512 * 1024
# Irregular (non-128-divisible) sizes up to this many elements are handled as
# one full-array block (sublane padding of a (1, n) block stays < ~1 MiB).
_SMALL_IRREGULAR_MAX = 32 * 1024


def _sigmoid_kernel(x_ref, o_ref):
    # Exact sigmoid: 1 / (1 + exp(-x)), computed in f32.  Compute (EUP exp +
    # VPU add + exact reciprocal) is fully hidden under the HBM stream, so no
    # approx shortcuts are needed to stay at the bandwidth roofline.
    x = x_ref[...].astype(jnp.float32)
    o_ref[...] = pl.reciprocal(1.0 + jnp.exp(-x), approx=False).astype(o_ref.dtype)


def _run_sigmoid_2d(x2d: jax.Array, block_rows: int, cols: int) -> jax.Array:
    rows = x2d.shape[0]
    grid = (pl.cdiv(rows, block_rows),)
    return pl.pallas_call(
        _sigmoid_kernel,
        out_shape=jax.ShapeDtypeStruct((rows, cols), x2d.dtype),
        grid_spec=pltpu.PrefetchScalarGridSpec(
            num_scalar_prefetch=0,
            grid=grid,
            in_specs=[pl.BlockSpec((block_rows, cols), lambda i: (i, 0))],
            out_specs=pl.BlockSpec((block_rows, cols), lambda i: (i, 0)),
        ),
        compiler_params=pltpu.CompilerParams(
            dimension_semantics=("parallel",),
        ),
    )(x2d)


def sigmoid_pallas(x: jax.Array) -> jax.Array:
    """Elementwise sigmoid of an arbitrarily-shaped array via a Pallas kernel."""
    orig_shape = x.shape
    orig_dtype = x.dtype
    n = x.size
    if n == 0:
        return x

    flat = x.reshape(-1)

    # Fast path: pick a lane-dense width that divides n exactly (zero-copy).
    cols = next((c for c in _LANE_CHOICES if n % c == 0), None)

    if cols is not None:
        rows = n // cols
        # ~2 MiB f32 per block; round the row-block to a sublane multiple
        # unless it already covers the whole array (full-dim blocks are legal).
        block_rows = min(rows, max(1, _TARGET_BLOCK_ELEMS // cols))
        if block_rows < rows:
            block_rows = max(8, (block_rows // 8) * 8)
        out2d = _run_sigmoid_2d(flat.reshape(rows, cols), block_rows, cols)
        return out2d.reshape(orig_shape)

    if n <= _SMALL_IRREGULAR_MAX:
        # Small irregular size: one full-array (1, n) block, no pad / slice.
        out2d = _run_sigmoid_2d(flat.reshape(1, n), 1, n)
        return out2d.reshape(orig_shape)

    # Rare large irregular size: pad to a multiple of 128 (one extra HBM pass).
    # TODO(synk): could split into a 128-divisible body + small tail to avoid
    # the full pad/slice copies for large non-128-divisible sizes.
    cols = _LANE
    padded = ((n + cols - 1) // cols) * cols
    flat = jnp.pad(flat, (0, padded - n))
    rows = padded // cols
    block_rows = min(rows, max(1, _TARGET_BLOCK_ELEMS // cols))
    if block_rows < rows:
        block_rows = max(8, (block_rows // 8) * 8)
    out2d = _run_sigmoid_2d(flat.reshape(rows, cols), block_rows, cols)
    out_flat = out2d.reshape(-1)[:n]
    return out_flat.reshape(orig_shape).astype(orig_dtype)


class SigmoidPallas:
    """JAX/Pallas port of pytorch_nndct ...quantization.modules.activation.Sigmoid.

    Only approx_mode='no_approx' (exact sigmoid) is supported; the polynomial /
    LUT approximation paths depend on the external `approx` helpers.
    """

    def __init__(self, approx_mode="no_approx", approx_degree=3, exp_table_size=1):
        self.approx_mode = approx_mode
        self.approx_degree = approx_degree
        self.exp_table_size = exp_table_size

    def __call__(self, x):
        if self.approx_mode == "no_approx":
            return sigmoid_pallas(x)
        # TODO(synk): 'exp_poly' / 'positive_poly' / 'exp_lut' approx paths rely
        # on the external `approx` module and are not reproduced here.
        raise NotImplementedError(
            f"approx_mode {self.approx_mode} is not implemented in SigmoidPallas"
        )


if __name__ == "__main__":
    key = jax.random.PRNGKey(0)
    mod = SigmoidPallas(approx_mode="no_approx")

    # Primary NCHW example (2048 elements -> zero-copy lane-dense path).
    x = jax.random.normal(key, (2, 4, 16, 16), dtype=jnp.float32)
    out = jax.block_until_ready(mod(x))
    ref = jax.nn.sigmoid(x)
    assert out.shape == x.shape and out.dtype == x.dtype
    assert jnp.max(jnp.abs(out - ref)) < 1e-5

    # Irregular size (105 elements -> single full-array block, no padding).
    x2 = jax.random.normal(jax.random.PRNGKey(1), (3, 5, 7), dtype=jnp.float32)
    out2 = jax.block_until_ready(mod(x2))
    ref2 = jax.nn.sigmoid(x2)
    assert out2.shape == x2.shape and out2.dtype == x2.dtype
    assert jnp.max(jnp.abs(out2 - ref2)) < 1e-5

    # bf16 input (multi-block path, lane-dense, dtype preserved).
    x3 = jax.random.normal(jax.random.PRNGKey(2), (4, 8, 32, 32), dtype=jnp.bfloat16)
    out3 = jax.block_until_ready(mod(x3))
    ref3 = jax.nn.sigmoid(x3.astype(jnp.float32)).astype(jnp.bfloat16)
    assert out3.shape == x3.shape and out3.dtype == x3.dtype
    assert jnp.max(jnp.abs(out3.astype(jnp.float32) - ref3.astype(jnp.float32))) < 2e-2

    print("KERNEL_OK")
</pallas_src>

<mosaic_0001>
module attributes {stable_mosaic.version = 11 : i64} {
  func.func @_sigmoid_kernel(%arg0: i32, %arg1: memref<1x2048xf32, #tpu.memory_space<vmem>>, %arg2: memref<1x2048xf32, #tpu.memory_space<vmem>>) attributes {dimension_semantics = [#tpu.dimension_semantics<parallel>], iteration_bounds = array<i64: 1>, scalar_prefetch = 0 : i64, scratch_operands = 0 : i64, tpu.core_type = #tpu.core_type<tc>, window_params = [{transform_indices = @transform_0, window_bounds = array<i64: 1, 2048>}, {transform_indices = @transform_1, window_bounds = array<i64: 1, 2048>}]} {
    %c0 = arith.constant 0 : index
    %c0_0 = arith.constant 0 : index
    %0 = vector.load %arg1[%c0, %c0_0] : memref<1x2048xf32, #tpu.memory_space<vmem>>, vector<1x2048xf32>
    %cst = arith.constant 0.000000e+00 : f32
    %1 = vector.broadcast %cst : f32 to vector<1x2048xf32>
    %2 = arith.subf %1, %0 : vector<1x2048xf32>
    %3 = math.exp %2 : vector<1x2048xf32>
    %cst_1 = arith.constant 1.000000e+00 : f32
    %4 = vector.broadcast %cst_1 : f32 to vector<1x2048xf32>
    %5 = arith.addf %4, %3 : vector<1x2048xf32>
    %6 = tpu.reciprocal %5 : vector<1x2048xf32> -> vector<1x2048xf32>
    %c0_2 = arith.constant 0 : index
    %c0_3 = arith.constant 0 : index
    %7 = vector.load %arg2[%c0_2, %c0_3] : memref<1x2048xf32, #tpu.memory_space<vmem>>, vector<1x2048xf32>
    tpu.vector_store %arg2[%c0_2, %c0_3], %6 {strides = array<i32>} : memref<1x2048xf32, #tpu.memory_space<vmem>>, vector<1x2048xf32>,
    return
  }
  func.func @transform_0(%arg0: i32) -> (i32, i32) {
    %c0_i32 = arith.constant 0 : i32
    %c0_i32_0 = arith.constant 0 : i32
    return %arg0, %c0_i32 : i32, i32
  }
  func.func @transform_1(%arg0: i32) -> (i32, i32) {
    %c0_i32 = arith.constant 0 : i32
    %c0_i32_0 = arith.constant 0 : i32
    return %arg0, %c0_i32 : i32, i32
  }
}

</mosaic_0001>

<bundles_post_ra>
// kernel: tpu_custom_call.1
= control target key start
LH: loop header
LB: loop body
LE: loop exit
PB: predicated region body
PF: predicated region fallthrough
CT: control target
= control target key end

     0   :  { %6 = vsyncpa [#allocation3], 0  ;;  %s160_s0 = inlined_call_operand.hbm [shape: f32[1,2048], index: 0, kind: input, shape index: {}]   ;;  %s161_s1 = inlined_call_operand.hbm [shape: f32[1,2048], index: 1, kind: output, shape index: {}]  }
   0x1   :  { %7 = vsyncpa [#allocation4], 0  ;;  %s13_s8 = sshll.u32 %s160_s0, 4  ;;  %s142_s9 = smov [#allocation2]   ;;  %s14_s8 = int_to_ptr.hbm [resolvable:$true] %s13_s8 }
   0x2   :  { %s15_s10 = sshll.u32 %s142_s9, 4  ;;  %s16_s10 = int_to_ptr.vmem [resolvable:$true] %s15_s10 }
   0x3   :  { %18 = dma.hbm_to_vmem [thread:$0]  %s14_s8, 256, %s16_s10, [#allocation3]  }
   0x4   :  { %138 = dma.done.wait [#allocation3], 256  }
   0x5   :  { %139 = vsyncadd [#allocation3], 4294967040  ;;  %v23_v0 = vld [vmem:[#allocation2] sm:$0xff]  ;;  %v24_v1 = vld [vmem:[#allocation2 + $0x8] sm:$0xff]  ;;  %s143_s0 = smov [#allocation5]   ;;  %s70_s14 = sshll.u32 %s161_s1, 4  ;;  %s71_s14 = int_to_ptr.hbm [resolvable:$true] %s70_s14 }
   0x6   :  { %v25_v2 = vsub.f32 0.0, %v23_v0  ;;  %v26_v3 = vsub.f32 0.0, %v24_v1  ;;  %s68_s11 = sshll.u32 %s143_s0, 4  ;;  %s69_s11 = int_to_ptr.vmem [resolvable:$true] %s68_s11 }
   0x8   :  { %v27_v4 = vmul.f32 1.442695, %v25_v2  ;;  %v29_v5 = vmul.f32 1.442695, %v26_v3 }
   0xa   :  { %82 = vpow2.f32 %v27_v4 }
   0xb   :  { %84 = vpow2.f32 %v29_v5 }
  0x10   :  { %v83_v6 = vpop.eup %82 }
  0x11   :  { %v85_v7 = vpop.eup %84  ;;  %v31_v8 = vadd.f32 1.0, %v83_v6 }
  0x12   :  { %v32_v9 = vadd.f32 1.0, %v85_v7 }
  0x13   :  { %86 = vrcp.f32 %v31_v8  ;;  %vm38_vm0 = vweird.f32 %v31_v8  ;;  %v44_v13 = vand.u32 2147483648, %v31_v8  ;;  %v42_v16 = vand.u32 2147483647, %v31_v8 }
  0x14   :  { %88 = vrcp.f32 %v32_v9  ;;  %v58_v17 = vand.u32 2147483648, %v32_v9  ;;  %vm52_vm2 = vweird.f32 %v32_v9  ;;  %v56_v19 = vand.u32 2147483647, %v32_v9 }
  0x15   :  { %v45_v21 = vor.u32 1.1754944e-38, %v44_v13  ;;  %vm43_vm5 = vcmp.eq.f32.partialorder %v42_v16, 8.507059e+37 }
  0x16   :  { %v59_v24 = vor.u32 1.1754944e-38, %v58_v17  ;;  %vm57_vm7 = vcmp.eq.f32.partialorder %v56_v19, 8.507059e+37 }
  0x19   :  { %v87_v10 = vpop.eup %86 }
  0x1a   :  { %v89_v11 = vpop.eup %88  ;;  %v34_v12 = vmul.f32 %v87_v10, %v31_v8  ;;  %vm39_vm1 = vweird.f32 %v87_v10 }
  0x1b   :  { %v48_v14 = vmul.f32 %v89_v11, %v32_v9  ;;  %vm53_vm3 = vweird.f32 %v89_v11  ;;  %vm40_vm4 = vmor %vm38_vm0, %vm39_vm1 }
  0x1c   :  { %v35_v15 = vsub.f32 1.0, %v34_v12  ;;  %vm54_vm6 = vmor %vm52_vm2, %vm53_vm3 }
  0x1d   :  { %v49_v18 = vsub.f32 1.0, %v48_v14 }
  0x1e   :  { %v36_v20 = vmul.f32 %v87_v10, %v35_v15 }
  0x1f   :  { %v50_v22 = vmul.f32 %v89_v11, %v49_v18 }
  0x20   :  { %v37_v23 = vadd.f32 %v87_v10, %v36_v20 }
  0x21   :  { %v51_v25 = vadd.f32 %v89_v11, %v50_v22 }
  0x22   :  { %v41_v26 = vsel %vm40_vm4, %v87_v10, %v37_v23 }
  0x23   :  { %v46_v27 = vsel %vm43_vm5, %v45_v21, %v41_v26  ;;  %v55_v28 = vsel %vm54_vm6, %v89_v11, %v51_v25 }
  0x24   :  { %61 = vst [vmem:[#allocation5] sm:$0xff] %v46_v27  ;;  %v60_v29 = vsel %vm57_vm7, %v59_v24, %v55_v28 }
  0x25   :  { %62 = vst [vmem:[#allocation5 + $0x8] sm:$0xff] %v60_v29 }
  0x26   :  { %73 = dma.vmem_to_hbm [thread:$0]  %s69_s11, 256, %s71_s14, [#allocation4]  }
  0x27   :  { %140 = dma.done.wait [#allocation4], 256  }
  0x28   :  { %141 = vsyncadd [#allocation4], 4294967040 }
  0x29   :  { %78 = vsyncpa [#allocation3], 1 }
  0x2a   :  { %79 = vsyncpa [#allocation4], 1 }

</bundles_post_ra>
